<compile_context>
chip_gen: v7x
topology: tpu7x:2x2x1
jax: 0.10.0
libtpu: 0.0.40
codegen_flags: <defaults>
</compile_context>

<pallas_src>
import functools

import jax
import jax.numpy as jnp
from jax.experimental import pallas as pl
from jax.experimental.pallas import tpu as pltpu


def _round_up(x, m):
    return ((x + m - 1) // m) * m


def inverse_model_kernel(s_ref, ns_ref, w_l_ref, w_r_ref, b_enc_ref,
                         w_head_ref, b_head_ref, out_ref):
    """s_ref/ns_ref: (TB, C*L) f32 batch tiles. out_ref: (TB, A_pad) bf16."""
    # bf16 cast in-kernel (VPU, hidden under the input DMA) — MXU inputs only.
    s = s_ref[...].astype(jnp.bfloat16)
    ns = ns_ref[...].astype(jnp.bfloat16)

    # Block-diagonal encoder:  enc = [ReLU(s@W + b) | ReLU(ns@W + b)]  (TB, 2F)
    #   cat(s, ns) @ [[W,0],[0,W]] == s @ [W|0] + ns @ [0|W]
    # -> no in-kernel concat, no enc slicing.  f32 accumulation on the MXU.
    enc = (jnp.dot(s, w_l_ref[...], preferred_element_type=jnp.float32)
           + jnp.dot(ns, w_r_ref[...], preferred_element_type=jnp.float32))
    enc = jnp.maximum(enc + b_enc_ref[...], 0.0)            # f32 elementwise

    # Single head matmul: (TB, 2F) x (2F, A_pad), lane-dense padded output.
    logits = jnp.dot(enc.astype(jnp.bfloat16), w_head_ref[...],
                     preferred_element_type=jnp.float32) + b_head_ref[...]
    out_ref[...] = jnp.tanh(logits).astype(out_ref.dtype)   # bf16 store


def prepare_params(w_enc, b_enc, w_head, b_head):
    """One-time weight prep (hoisted out of the per-call forward path):
    block-diagonal encoder split, head transpose + lane padding, bf16 casts."""
    flat, feat = w_enc.shape                    # (C*L, F)
    act = w_head.shape[0]                       # A
    a_pad = _round_up(act, 128)                 # lane-dense output width
    w_bf = w_enc.astype(jnp.bfloat16)
    w_l = jnp.zeros((flat, 2 * feat), jnp.bfloat16).at[:, :feat].set(w_bf)
    w_r = jnp.zeros((flat, 2 * feat), jnp.bfloat16).at[:, feat:].set(w_bf)
    b_enc_cat = jnp.concatenate([b_enc, b_enc]).reshape(1, 2 * feat)
    w_h = jnp.zeros((2 * feat, a_pad), jnp.bfloat16).at[:, :act].set(
        jnp.transpose(w_head).astype(jnp.bfloat16))
    b_h = jnp.zeros((1, a_pad), jnp.float32).at[0, :act].set(
        b_head.astype(jnp.float32))
    return {
        "w_enc_l": w_l,                          # (C*L, 2F) bf16  = [W | 0]
        "w_enc_r": w_r,                          # (C*L, 2F) bf16  = [0 | W]
        "b_enc": b_enc_cat.astype(jnp.float32),  # (1, 2F)  f32    = [b | b]
        "w_head": w_h,                           # (2F, A_pad) bf16
        "b_head": b_h,                           # (1, A_pad) f32
    }


def _pick_batch_tile(B):
    if B < 256:
        return B                                 # single step; block == full dim
    # >= 2-4 grid steps at large B (feeds both v7x TensorCores), tiles >= 128
    # rows to amortize the ~0.35 us/step overhead, multiple of 16 for bf16 out.
    return max(128, min(2048, _round_up(pl.cdiv(B, 4), 16)))


@functools.partial(jax.jit, static_argnames=("action_dim",))
def inverse_model_forward(state, next_state, params, *, action_dim):
    """state, next_state: (B, C, L) float32. Returns (B, action_dim) f32."""
    B, C, L = state.shape
    CL = C * L
    F2 = params["w_enc_l"].shape[1]             # 2 * feature_dim
    A_pad = params["w_head"].shape[1]

    # Pure view reshapes — no HBM copy, no dtype cast, no batch padding.
    s = state.reshape(B, CL)
    ns = next_state.reshape(B, CL)

    TB = _pick_batch_tile(B)
    grid = (pl.cdiv(B, TB),)                    # ragged last tile: OOB writes dropped

    resident = dict(pipeline_mode=pl.Buffered(1))   # weights: 1 buffer, stay resident

    cost = pl.CostEstimate(
        flops=4 * B * CL * F2 + 2 * B * F2 * A_pad,
        transcendentals=B * A_pad,
        bytes_accessed=(2 * B * CL * 4 + B * A_pad * 2
                        + (2 * CL * F2 + F2 * A_pad) * 2 + (F2 + A_pad) * 4))

    out = pl.pallas_call(
        inverse_model_kernel,
        out_shape=jax.ShapeDtypeStruct((B, A_pad), jnp.bfloat16),
        grid_spec=pl.GridSpec(
            grid=grid,
            in_specs=[
                pl.BlockSpec((TB, CL), lambda i: (i, 0)),          # state tile
                pl.BlockSpec((TB, CL), lambda i: (i, 0)),          # next_state tile
                pl.BlockSpec((CL, F2), lambda i: (0, 0), **resident),
                pl.BlockSpec((CL, F2), lambda i: (0, 0), **resident),
                pl.BlockSpec((1, F2), lambda i: (0, 0), **resident),
                pl.BlockSpec((F2, A_pad), lambda i: (0, 0), **resident),
                pl.BlockSpec((1, A_pad), lambda i: (0, 0), **resident),
            ],
            out_specs=pl.BlockSpec((TB, A_pad), lambda i: (i, 0)),
        ),
        compiler_params=pltpu.CompilerParams(
            dimension_semantics=("parallel",),       # shard batch across v7x TCs
            vmem_limit_bytes=48 * 1024 * 1024),      # explicit budget < v7x 64 MiB
        cost_estimate=cost,
    )(s, ns, params["w_enc_l"], params["w_enc_r"], params["b_enc"],
      params["w_head"], params["b_head"])

    # Tiny slice + cast back to f32 to preserve the module's (B, A) output.
    return out[:, :action_dim].astype(jnp.float32)


def init_params(key, in_channels, length, feature_dim, action_dim):
    # TODO(synk): the Aeris encoder is an external module in the PyTorch spec;
    # synthesized here as a deterministic full-length Conv1d + ReLU (a matmul).
    k_enc, k_head = jax.random.split(key)
    flat = in_channels * length
    w_enc = (jax.random.normal(k_enc, (flat, feature_dim), jnp.float32)
             * (1.0 / jnp.sqrt(flat)))
    b_enc = jnp.zeros((feature_dim,), jnp.float32)
    # Head: xavier_uniform_ like PyTorch (fan_in = 2F, fan_out = A).
    bound = jnp.sqrt(6.0 / (2 * feature_dim + action_dim))
    w_head = jax.random.uniform(k_head, (action_dim, 2 * feature_dim),
                                jnp.float32, -bound, bound)
    b_head = jnp.zeros((action_dim,), jnp.float32)
    return w_enc, b_enc, w_head, b_head


if __name__ == "__main__":
    B, C, L = 8, 4, 16          # batch, channels, length (NCL)
    feature_dim = 32            # config.forward_model_kernels_count
    action_dim = 4

    key = jax.random.PRNGKey(0)
    k_s, k_ns, k_p = jax.random.split(key, 3)
    state = jax.random.normal(k_s, (B, C, L), jnp.float32)
    next_state = jax.random.normal(k_ns, (B, C, L), jnp.float32)
    w_enc, b_enc, w_head, b_head = init_params(k_p, C, L, feature_dim, action_dim)

    # Weight prep done ONCE (outside the per-call forward path).
    params = prepare_params(w_enc, b_enc, w_head, b_head)

    pred = inverse_model_forward(state, next_state, params,
                                 action_dim=action_dim)
    pred = jax.block_until_ready(pred)

    # Pure-JAX f32 reference (bf16 MXU inputs + bf16 store => relaxed tol).
    def ref(s, ns):
        fs = jnp.maximum(s.reshape(B, -1) @ w_enc + b_enc, 0.0)
        fns = jnp.maximum(ns.reshape(B, -1) @ w_enc + b_enc, 0.0)
        xcat = jnp.concatenate([fs, fns], axis=1)
        return jnp.tanh(xcat @ w_head.T + b_head)

    expected = ref(state, next_state)
    assert pred.shape == (B, action_dim)
    assert jnp.allclose(pred, expected, atol=5e-2, rtol=5e-2)
    print("KERNEL_OK")
</pallas_src>

<mosaic_0001>
module attributes {stable_mosaic.version = 11 : i64} {
  func.func @inverse_model_kernel(%arg0: i32, %arg1: memref<8x64xf32, #tpu.memory_space<vmem>>, %arg2: memref<8x64xf32, #tpu.memory_space<vmem>>, %arg3: memref<64x64xbf16, #tpu.memory_space<vmem>>, %arg4: memref<64x64xbf16, #tpu.memory_space<vmem>>, %arg5: memref<1x64xf32, #tpu.memory_space<vmem>>, %arg6: memref<64x128xbf16, #tpu.memory_space<vmem>>, %arg7: memref<1x128xf32, #tpu.memory_space<vmem>>, %arg8: memref<8x128xbf16, #tpu.memory_space<vmem>>) attributes {dimension_semantics = [#tpu.dimension_semantics<parallel>], iteration_bounds = array<i64: 1>, scalar_prefetch = 0 : i64, scratch_operands = 0 : i64, tpu.core_type = #tpu.core_type<tc>, window_params = [{transform_indices = @transform_0, window_bounds = array<i64: 8, 64>}, {transform_indices = @transform_1, window_bounds = array<i64: 8, 64>}, {pipeline_mode = #tpu.pipeline_mode<synchronous>, transform_indices = @transform_2, window_bounds = array<i64: 64, 64>}, {pipeline_mode = #tpu.pipeline_mode<synchronous>, transform_indices = @transform_3, window_bounds = array<i64: 64, 64>}, {pipeline_mode = #tpu.pipeline_mode<synchronous>, transform_indices = @transform_4, window_bounds = array<i64: 1, 64>}, {pipeline_mode = #tpu.pipeline_mode<synchronous>, transform_indices = @transform_5, window_bounds = array<i64: 64, 128>}, {pipeline_mode = #tpu.pipeline_mode<synchronous>, transform_indices = @transform_6, window_bounds = array<i64: 1, 128>}, {transform_indices = @transform_7, window_bounds = array<i64: 8, 128>}]} {
    %c0 = arith.constant 0 : index
    %c0_0 = arith.constant 0 : index
    %0 = vector.load %arg1[%c0, %c0_0] : memref<8x64xf32, #tpu.memory_space<vmem>>, vector<8x64xf32>
    %1 = arith.truncf %0 : vector<8x64xf32> to vector<8x64xbf16>
    %c0_1 = arith.constant 0 : index
    %c0_2 = arith.constant 0 : index
    %2 = vector.load %arg2[%c0_1, %c0_2] : memref<8x64xf32, #tpu.memory_space<vmem>>, vector<8x64xf32>
    %3 = arith.truncf %2 : vector<8x64xf32> to vector<8x64xbf16>
    %c0_3 = arith.constant 0 : index
    %c0_4 = arith.constant 0 : index
    %4 = vector.load %arg3[%c0_3, %c0_4] : memref<64x64xbf16, #tpu.memory_space<vmem>>, vector<64x64xbf16>
    %cst = arith.constant dense<0.000000e+00> : vector<8x64xf32>
    %5 = tpu.matmul %1, %4, %cst {dimension_numbers = #tpu.dot_dimension_numbers<[1], [0], [0], [1], [0, 0, 1, 1], [], []>} : vector<8x64xbf16>, vector<64x64xbf16>, vector<8x64xf32> -> vector<8x64xf32>
    %c0_5 = arith.constant 0 : index
    %c0_6 = arith.constant 0 : index
    %6 = vector.load %arg4[%c0_5, %c0_6] : memref<64x64xbf16, #tpu.memory_space<vmem>>, vector<64x64xbf16>
    %cst_7 = arith.constant dense<0.000000e+00> : vector<8x64xf32>
    %7 = tpu.matmul %3, %6, %cst_7 {dimension_numbers = #tpu.dot_dimension_numbers<[1], [0], [0], [1], [0, 0, 1, 1], [], []>} : vector<8x64xbf16>, vector<64x64xbf16>, vector<8x64xf32> -> vector<8x64xf32>
    %8 = arith.addf %5, %7 : vector<8x64xf32>
    %c0_8 = arith.constant 0 : index
    %c0_9 = arith.constant 0 : index
    %9 = vector.load %arg5[%c0_8, %c0_9] : memref<1x64xf32, #tpu.memory_space<vmem>>, vector<1x64xf32>
    %10 = vector.broadcast %9 : vector<1x64xf32> to vector<8x64xf32>
    %11 = arith.addf %8, %10 : vector<8x64xf32>
    %cst_10 = arith.constant 0.000000e+00 : f32
    %12 = vector.broadcast %cst_10 : f32 to vector<8x64xf32>
    %13 = arith.maximumf %11, %12 : vector<8x64xf32>
    %14 = arith.truncf %13 : vector<8x64xf32> to vector<8x64xbf16>
    %c0_11 = arith.constant 0 : index
    %c0_12 = arith.constant 0 : index
    %15 = vector.load %arg6[%c0_11, %c0_12] : memref<64x128xbf16, #tpu.memory_space<vmem>>, vector<64x128xbf16>
    %cst_13 = arith.constant dense<0.000000e+00> : vector<8x128xf32>
    %16 = tpu.matmul %14, %15, %cst_13 {dimension_numbers = #tpu.dot_dimension_numbers<[1], [0], [0], [1], [0, 0, 1, 1], [], []>} : vector<8x64xbf16>, vector<64x128xbf16>, vector<8x128xf32> -> vector<8x128xf32>
    %c0_14 = arith.constant 0 : index
    %c0_15 = arith.constant 0 : index
    %17 = vector.load %arg7[%c0_14, %c0_15] : memref<1x128xf32, #tpu.memory_space<vmem>>, vector<1x128xf32>
    %18 = vector.broadcast %17 : vector<1x128xf32> to vector<8x128xf32>
    %19 = arith.addf %16, %18 : vector<8x128xf32>
    %20 = math.tanh %19 : vector<8x128xf32>
    %21 = arith.truncf %20 : vector<8x128xf32> to vector<8x128xbf16>
    %c0_16 = arith.constant 0 : index
    %c0_17 = arith.constant 0 : index
    %22 = vector.load %arg8[%c0_16, %c0_17] : memref<8x128xbf16, #tpu.memory_space<vmem>>, vector<8x128xbf16>
    tpu.vector_store %arg8[%c0_16, %c0_17], %21 {strides = array<i32>} : memref<8x128xbf16, #tpu.memory_space<vmem>>, vector<8x128xbf16>,
    return
  }
  func.func @transform_0(%arg0: i32) -> (i32, i32) {
    %c0_i32 = arith.constant 0 : i32
    %c0_i32_0 = arith.constant 0 : i32
    return %arg0, %c0_i32 : i32, i32
  }
  func.func @transform_1(%arg0: i32) -> (i32, i32) {
    %c0_i32 = arith.constant 0 : i32
    %c0_i32_0 = arith.constant 0 : i32
    return %arg0, %c0_i32 : i32, i32
  }
  func.func @transform_2(%arg0: i32) -> (i32, i32) {
    %c0_i32 = arith.constant 0 : i32
    %c0_i32_0 = arith.constant 0 : i32
    %c0_i32_1 = arith.constant 0 : i32
    return %c0_i32, %c0_i32_0 : i32, i32
  }
  func.func @transform_3(%arg0: i32) -> (i32, i32) {
    %c0_i32 = arith.constant 0 : i32
    %c0_i32_0 = arith.constant 0 : i32
    %c0_i32_1 = arith.constant 0 : i32
    return %c0_i32, %c0_i32_0 : i32, i32
  }
  func.func @transform_4(%arg0: i32) -> (i32, i32) {
    %c0_i32 = arith.constant 0 : i32
    %c0_i32_0 = arith.constant 0 : i32
    %c0_i32_1 = arith.constant 0 : i32
    return %c0_i32, %c0_i32_0 : i32, i32
  }
  func.func @transform_5(%arg0: i32) -> (i32, i32) {
    %c0_i32 = arith.constant 0 : i32
    %c0_i32_0 = arith.constant 0 : i32
    %c0_i32_1 = arith.constant 0 : i32
    return %c0_i32, %c0_i32_0 : i32, i32
  }
  func.func @transform_6(%arg0: i32) -> (i32, i32) {
    %c0_i32 = arith.constant 0 : i32
    %c0_i32_0 = arith.constant 0 : i32
    %c0_i32_1 = arith.constant 0 : i32
    return %c0_i32, %c0_i32_0 : i32, i32
  }
  func.func @transform_7(%arg0: i32) -> (i32, i32) {
    %c0_i32 = arith.constant 0 : i32
    %c0_i32_0 = arith.constant 0 : i32
    return %arg0, %c0_i32 : i32, i32
  }
}

</mosaic_0001>

<bundles_post_ra>
// kernel: inverse_model_forward.1
= control target key start
LH: loop header
LB: loop body
LE: loop exit
PB: predicated region body
PF: predicated region fallthrough
CT: control target
= control target key end

     0   :  { %12 = vsyncpa [#allocation3], 0  ;;  %s550_s0 = inlined_call_operand.vmem [shape: f32[8,64], index: 0, kind: input, shape index: {}]   ;;  %s551_s1 = inlined_call_operand.vmem [shape: f32[8,64], index: 1, kind: input, shape index: {}]   ;;  %s552_s2 = inlined_call_operand.vmem [shape: bf16[64,64], index: 2, kind: input, shape index: {}]   ;;  %s553_s3 = inlined_call_operand.hbm [shape: bf16[64,64], index: 3, kind: input, shape index: {}]   ;;  %s554_s4 = inlined_call_operand.vmem [shape: f32[1,64], index: 4, kind: input, shape index: {}]   ;;  %s555_s5 = inlined_call_operand.hbm [shape: bf16[64,128], index: 5, kind: input, shape index: {}]   ;;  %s556_s6 = inlined_call_operand.vmem [shape: f32[1,128], index: 6, kind: input, shape index: {}]   ;;  %s557_s7 = inlined_call_operand.vmem [shape: bf16[8,128], index: 7, kind: output, shape index: {}]  }
   0x1   :  { %13 = vsyncpa [#allocation5], 0  ;;  %s447_s24 = smov [#allocation2]   ;;  %s399_s28 = scalar_lea.hbm %s553_s3, 512 }
   0x2   :  { %s25_s25 = sshll.u32 %s447_s24, 4  ;;  %p400_p0 = scmp.ne.s32.totalorder %s553_s3, %s399_s28  ;;  %s26_s25 = int_to_ptr.vmem [resolvable:$true] %s25_s25 }
   0x3   :  { %p403_p1 = scmp.lt.u32.totalorder %s399_s28, %s553_s3 }
   0x5   :  { %p405_p2 = pnand %p403_p1, %p400_p0 }
   0x7   :  { %408 = shalt.err (!%p405_p2)
}
   0x8   :  { %s409_s10 = scalar_lea.vmem %s26_s25, 512  ;;  %p414_p4 = scmp.lt.s32.totalorder %s26_s25, %s26_s25 }
   0x9   :  { %p410_p3 = scmp.ne.s32.totalorder %s26_s25, %s409_s10  ;;  %p415_p5 = scmp.lt.s32.totalorder %s409_s10, %s409_s10 }
   0xb   :  { %p416_p6 = por %p415_p5, %p414_p4 }
   0xd   :  { %p417_p7 = pnand %p416_p6, %p410_p3 }
   0xf   :  { %420 = shalt.err (!%p417_p7)
}
  0x10   :  { %s448_s11 = smov 64   ;;  %s449_s12 = smov 4  }
  0x11   :  { %31 = dma.hbm_to_vmem [thread:$0]  %s553_s3, 512, %s26_s25, [#allocation3], %s448_s11, %s448_s11, %s449_s12  }
  0x12   :  { %s450_s15 = smov [#allocation4]   ;;  %s421_s19 = scalar_lea.hbm %s555_s5, 512 }
  0x13   :  { %s39_s16 = sshll.u32 %s450_s15, 4  ;;  %p422_p8 = scmp.ne.s32.totalorder %s555_s5, %s421_s19  ;;  %s40_s16 = int_to_ptr.vmem [resolvable:$true] %s39_s16 }
  0x14   :  { %p425_p9 = scmp.lt.u32.totalorder %s421_s19, %s555_s5 }
  0x16   :  { %p427_p10 = pnand %p425_p9, %p422_p8 }
  0x18   :  { %430 = shalt.err (!%p427_p10)
}
  0x19   :  { %s431_s24 = scalar_lea.vmem %s40_s16, 512  ;;  %p436_p12 = scmp.lt.s32.totalorder %s40_s16, %s40_s16 }
  0x1a   :  { %p432_p11 = scmp.ne.s32.totalorder %s40_s16, %s431_s24  ;;  %p437_p13 = scmp.lt.s32.totalorder %s431_s24, %s431_s24 }
  0x1c   :  { %p438_p0 = por %p437_p13, %p436_p12 }
  0x1e   :  { %p439_p1 = pnand %p438_p0, %p432_p11 }
  0x20   :  { %442 = shalt.err (!%p439_p1)
}
  0x21   :  { %45 = dma.hbm_to_vmem [thread:$0]  %s555_s5, 512, %s40_s16, [#allocation5], %s448_s11, %s448_s11, %s449_s12  }
  0x22   :  { %443 = dma.done.wait [#allocation3], 512  }
  0x23   :  { %444 = vsyncadd [#allocation3], 4294966784 }
  0x24   :  { %445 = dma.done.wait [#allocation5], 512  }
  0x25   :  { %446 = vsyncadd [#allocation5], 4294966784  ;;  %v451_v0 = vmov 0.0   ;;  %vm452_vm0 = vmmov 0   ;;  %v385_v1 = vld [vmem:[#allocation2] sm:$0xff]   ;;  %v387_v3 = vld [vmem:[#allocation2 + $0x8] sm:$0xff]  }
  0x26   :  { %343 = vmatprep.subr.bf16.mxu0 %v451_v0  ;;  %355 = vmatprep.subr.bf16.mxu1 %v451_v0  ;;  %v386_v2 = vld [vmem:[%s552_s2] sm:$0xff]   ;;  %v388_v4 = vld [vmem:[%s552_s2 + $0x8] sm:$0xff]   ;;  %v389_v5 = vld [vmem:[#allocation2 + $0x10] sm:$0xff]   ;;  %vm99_vm1 = vcmask 523264  }
  0x27   :  { %351 = vmatprep.mubr.msk.bf16.mxu0 %vm452_vm0, %v451_v0  ;;  %363 = vmatprep.mubr.msk.bf16.mxu1 %vm452_vm0, %v451_v0  ;;  %v390_v6 = vld [vmem:[%s552_s2 + $0x10] sm:$0xff]   ;;  %v391_v7 = vld [vmem:[#allocation2 + $0x18] sm:$0xff]   ;;  %v57_v9 = vld [vmem:[%s551_s1] sm:$0xff] }
  0x28   :  { %344 = vmatpush3.bf16.msra.mxu0 %v385_v1  ;;  %356 = vmatpush3.bf16.msra.mxu1 %v386_v2  ;;  %v392_v8 = vld [vmem:[%s552_s2 + $0x18] sm:$0xff]   ;;  %v55_v10 = vld [vmem:[%s550_s0] sm:$0xff]  ;;  %v58_v11 = vpack.c.bf16 %v57_v9, %v57_v9  ;;  %v394_v14 = vld [vmem:[#allocation4 + $0x8] sm:$0xff]  }
  0x29   :  { %345 = vmatprep.subr.bf16.mxu0 %v451_v0  ;;  %357 = vmatprep.subr.bf16.mxu1 %v451_v0  ;;  %v56_v12 = vpack.c.bf16 %v55_v10, %v55_v10  ;;  %v393_v13 = vld [vmem:[#allocation4] sm:$0xff]   ;;  %v395_v15 = vld [vmem:[#allocation4 + $0x10] sm:$0xff]   ;;  %v396_v16 = vld [vmem:[#allocation4 + $0x18] sm:$0xff]  }
  0x2a   :  { %v321_v19 = vld [vmem:[%s554_s4] ss:$0 sm:$0xff] }
  0x2b   :  { %v322_v30 = vld [vmem:[%s556_s6] ss:$0 sm:$0xff] }
  0x2c   :  { %346 = vmatpush3.bf16.msra.mxu0 %v387_v3  ;;  %358 = vmatpush3.bf16.msra.mxu1 %v388_v4 }
  0x2d   :  { %347 = vmatprep.subr.bf16.mxu0 %v451_v0  ;;  %359 = vmatprep.subr.bf16.mxu1 %v451_v0 }
  0x30   :  { %348 = vmatpush3.bf16.msra.mxu0 %v389_v5  ;;  %360 = vmatpush3.bf16.msra.mxu1 %v390_v6 }
  0x31   :  { %349 = vmatprep.subr.bf16.mxu0 %v451_v0  ;;  %361 = vmatprep.subr.bf16.mxu1 %v451_v0 }
  0x34   :  { %350 = vmatpush3.bf16.msra.mxu0 %v391_v7  ;;  %362 = vmatpush3.bf16.msra.mxu1 %v392_v8 }
  0x35   :  { %367 = vmatprep.subr.bf16.mxu0 %v451_v0 }
  0x37   :  { %352 = vmatmul.mubr.msk.bf16.vlgmr.msra.gmra.mrb[0].mxu0 %vm99_vm1, %v58_v11  ;;  %364 = vmatmul.mubr.msk.bf16.vlgmr.msra.gmra.mrb[0].mxu1 %vm99_vm1, %v56_v12 }
  0x38   :  { %368 = vmatpush3.bf16.msra.mxu0 %v393_v13  ;;  %375 = vmatprep.mubr.msk.bf16.mxu0 %vm452_vm0, %v451_v0 }
  0x39   :  { %369 = vmatprep.subr.bf16.mxu0 %v451_v0 }
  0x3c   :  { %370 = vmatpush3.bf16.msra.mxu0 %v394_v14 }
  0x3d   :  { %371 = vmatprep.subr.bf16.mxu0 %v451_v0 }
  0x40   :  { %372 = vmatpush3.bf16.msra.mxu0 %v395_v15 }
  0x41   :  { %373 = vmatprep.subr.bf16.mxu0 %v451_v0 }
  0x44   :  { %374 = vmatpush3.bf16.msra.mxu0 %v396_v16 }
 0x10a   :  { %v137_v17 = vpop.f32.mrb[0].mxu0  ;;  %v204_v18 = vpop.f32.mrb[0].mxu1 }
 0x10b   :  { %v353_v20 = vpop.f32.mrb[1].mxu0  ;;  %v205_v21 = vadd.f32 %v204_v18, %v137_v17  ;;  %v365_v22 = vpop.f32.mrb[1].mxu1 }
 0x10c   :  { %v140_v23 = vpop.f32.mrb[2].mxu0  ;;  %v207_v24 = vpop.f32.mrb[2].mxu1 }
 0x10d   :  { %v354_v25 = vpop.f32.mrb[3].mxu0  ;;  %v217_v26 = vadd.f32 %v321_v19, %v205_v21  ;;  %v366_v27 = vpop.f32.mrb[3].mxu1 }
 0x10f   :  { %v218_v28 = vmax.f32 %v217_v26, 0.0 }
 0x111   :  { %v219_v29 = vpack.c.bf16 %v218_v28, %v218_v28 }
 0x113   :  { %376 = vmatmul.mubr.msk.bf16.vlgmr.msra.gmra.mrb[4].mxu0 %vm99_vm1, %v219_v29 }
 0x1e6   :  { %v296_v31 = vpop.f32.mrb[4].mxu0 }
 0x1e7   :  { %v297_v32 = vadd.f32 %v322_v30, %v296_v31  ;;  %v377_v33 = vpop.f32.mrb[5].mxu0 }
 0x1e8   :  { %v299_v34 = vpop.f32.mrb[6].mxu0 }
 0x1e9   :  { %397 = vtanh.f32 %v297_v32  ;;  %v378_v35 = vpop.f32.mrb[7].mxu0 }
 0x1f3   :  { %v398_v36 = vpop.eup %397 }
 0x1f4   :  { %v303_v37 = vpack.c.bf16 %v398_v36, %v398_v36 }
 0x1f6   :  { %304 = vst [vmem:[%s557_s7] sm:$0xf] %v303_v37 }
 0x1f7   :  { %309 = vsyncpa [#allocation3], 1 }
 0x1f8   :  { %310 = vsyncpa [#allocation5], 1 }

</bundles_post_ra>
